<compile_context>
chip_gen: v6e
topology: v6e:2x2x1
jax: 0.10.0
libtpu: 0.0.40
codegen_flags: <defaults>
</compile_context>

<pallas_src>
import functools

import jax
import jax.numpy as jnp
from jax import lax
from jax.experimental import pallas as pl
from jax.experimental.pallas import tpu as pltpu

LN_EPS = 1e-5


def _round_up(x, m):
    return ((x + m - 1) // m) * m


def text_encoder_kernel(x_ref, w_ref, p_ref, o_ref, *, e_real):
    # Linear: cast the f32 activation tile to bf16 in-kernel (hidden under the
    # DMA/MXU), then [TM, T](bf16) @ [T, E_pad](bf16) with f32 MXU accumulation.
    y = jnp.dot(x_ref[...].astype(jnp.bfloat16), w_ref[...],
                preferred_element_type=jnp.float32)
    y = y + p_ref[0:1, :]  # bias (row 0 of fused slab); padded lanes stay exactly 0

    # LayerNorm over the real E columns. Padded lanes of y are exactly zero
    # (w and b are zero-padded), so unmasked sums over E_pad equal sums over E.
    inv_e = 1.0 / float(e_real)
    s1 = jnp.sum(y, axis=-1, keepdims=True)
    s2 = jnp.sum(y * y, axis=-1, keepdims=True)
    mean = s1 * inv_e
    var = jnp.maximum(s2 * inv_e - mean * mean, 0.0)  # clamp tiny negatives
    inv = lax.rsqrt(var + LN_EPS)

    h = (y - mean) * inv
    # gamma (row 1) / beta (row 2); padded lanes have gamma=beta=0 -> output 0 there.
    h = h * p_ref[1:2, :] + p_ref[2:3, :]
    h = jnp.maximum(h, 0.0)  # ReLU; Dropout(0.3) -> identity in eval mode.
    o_ref[...] = h.astype(o_ref.dtype)


def prepare_text_encoder_params(w, b, gamma, beta):
    """Hoisted, call-once parameter prep (pad + cast + fuse). Not per-step.

    w: [T, E] (already transposed vs. PyTorch's [E, T]); b/gamma/beta: [E].
    Returns (w_bf16_padded [T, E_pad], params [3, E_pad] f32, E_real).
    """
    T, E = w.shape
    E_pad = _round_up(max(E, 128), 128)  # lane-dense feature dim
    w_bf = jnp.pad(w.astype(jnp.float32), ((0, 0), (0, E_pad - E))).astype(jnp.bfloat16)
    slab = jnp.stack(
        [jnp.reshape(b, (-1,)), jnp.reshape(gamma, (-1,)), jnp.reshape(beta, (-1,))]
    ).astype(jnp.float32)
    slab = jnp.pad(slab, ((0, 0), (0, E_pad - E)))  # zeros in padded lanes
    return w_bf, slab, E


def text_encoder_apply(x, w_bf, params, e_real, *, block_b=512,
                       out_dtype=jnp.bfloat16, trim=True):
    """x: [B, T] f32 (kept f32 in HBM; bf16 cast happens inside the kernel)."""
    B, T = x.shape
    assert w_bf.shape[0] == T
    E_pad = w_bf.shape[1]

    # Batch tile: multiple of 16 (bf16 sublane packing), large by default to
    # amortize per-step pipeline overhead; cap so the grid has >= 2 steps when
    # B allows it (lets the "parallel" axis split across v7x's two TensorCores).
    B16 = _round_up(B, 16)
    TM = min(block_b, B16)
    if B16 >= 32:
        TM = min(TM, _round_up(B16 // 2, 16))
    B_pad = _round_up(B, TM)

    x_p = x if B_pad == B else jnp.pad(x, ((0, B_pad - B), (0, 0)))

    grid = (B_pad // TM,)
    kernel = functools.partial(text_encoder_kernel, e_real=e_real)

    out_itemsize = jnp.dtype(out_dtype).itemsize
    # Double-buffered tiles (Pallas default) + resident weight/params; leave
    # headroom under v7x's 64 MiB physical VMEM.
    vmem_bytes = (2 * TM * T * 4                    # x tile, f32
                  + 2 * T * E_pad * 2               # weight, bf16
                  + 2 * 8 * E_pad * 4               # fused params (sublane-padded)
                  + 2 * TM * E_pad * out_itemsize)  # output tile
    vmem_limit = int(min(max(vmem_bytes + (1 << 20), 4 << 20), 48 << 20))

    cost = pl.CostEstimate(
        flops=2 * B_pad * T * E_pad + 10 * B_pad * E_pad,
        transcendentals=B_pad,  # one rsqrt per row
        bytes_accessed=x_p.size * 4 + w_bf.size * 2 + params.size * 4
                       + B_pad * E_pad * out_itemsize,
    )

    out = pl.pallas_call(
        kernel,
        out_shape=jax.ShapeDtypeStruct((B_pad, E_pad), out_dtype),
        grid=grid,
        in_specs=[
            pl.BlockSpec((TM, T), lambda i: (i, 0)),     # activation tile (pipelined)
            pl.BlockSpec((T, E_pad), lambda i: (0, 0)),  # weight, resident across grid
            pl.BlockSpec((3, E_pad), lambda i: (0, 0)),  # fused b/gamma/beta, resident
        ],
        out_specs=pl.BlockSpec((TM, E_pad), lambda i: (i, 0)),
        compiler_params=pltpu.CompilerParams(
            dimension_semantics=("parallel",),
            vmem_limit_bytes=vmem_limit,
        ),
        cost_estimate=cost,
    )(x_p, w_bf, params)

    # Only pay the slice when padding was actually added; with production E a
    # multiple of 128 (and B a multiple of the tile) this is a no-op.
    if trim and (B_pad != B or E_pad != e_real):
        out = out[:B, :e_real]
    return out


def text_encoder(x, w, b, gamma, beta, **kwargs):
    """Convenience wrapper: prepare (once) + apply. Prefer calling
    prepare_text_encoder_params() once at init for repeated invocations."""
    w_bf, params, e_real = prepare_text_encoder_params(w, b, gamma, beta)
    return text_encoder_apply(x, w_bf, params, e_real, **kwargs)


def reference(x, w, b, gamma, beta):
    # Same dtype path as the kernel: bf16 matmul inputs, f32 LN/ReLU epilogue.
    y = jnp.dot(x.astype(jnp.bfloat16), w.astype(jnp.bfloat16),
                preferred_element_type=jnp.float32)
    y = y + jnp.reshape(b, (1, -1))
    mean = jnp.mean(y, axis=-1, keepdims=True)
    var = jnp.mean((y - mean) ** 2, axis=-1, keepdims=True)
    h = (y - mean) * lax.rsqrt(var + LN_EPS)
    h = h * jnp.reshape(gamma, (1, -1)) + jnp.reshape(beta, (1, -1))
    return jnp.maximum(h, 0.0)


if __name__ == "__main__":
    B, TEXT_DIM, EMBED_DIM = 8, 32, 64

    key = jax.random.PRNGKey(0)
    kx, kw, kb, kg = jax.random.split(key, 4)

    # Deterministic synthetic parameters (shapes from nn.Linear / nn.LayerNorm).
    x = jax.random.normal(kx, (B, TEXT_DIM), dtype=jnp.float32)
    w = jax.random.normal(kw, (TEXT_DIM, EMBED_DIM), dtype=jnp.float32) * 0.05
    b = jax.random.normal(kb, (EMBED_DIM,), dtype=jnp.float32) * 0.01
    gamma = 1.0 + 0.1 * jax.random.normal(kg, (EMBED_DIM,), dtype=jnp.float32)
    beta = jnp.zeros((EMBED_DIM,), dtype=jnp.float32)

    # Hoisted parameter prep (call-once), then apply.
    w_bf, params, e_real = prepare_text_encoder_params(w, b, gamma, beta)
    out = text_encoder_apply(x, w_bf, params, e_real)
    out = jax.block_until_ready(out)

    assert out.shape == (B, EMBED_DIM)
    assert out.dtype == jnp.bfloat16

    ref = reference(x, w, b, gamma, beta)
    ref_bf = ref.astype(jnp.bfloat16).astype(jnp.float32)
    assert jnp.allclose(out.astype(jnp.float32), ref_bf, atol=2e-2, rtol=2e-2), \
        "mismatch vs reference"

    print("KERNEL_OK")
</pallas_src>

<mosaic_0001>
module attributes {stable_mosaic.version = 11 : i64} {
  func.func @text_encoder_kernel(%arg0: i32, %arg1: memref<16x32xf32, #tpu.memory_space<vmem>>, %arg2: memref<32x128xbf16, #tpu.memory_space<vmem>>, %arg3: memref<3x128xf32, #tpu.memory_space<vmem>>, %arg4: memref<16x128xbf16, #tpu.memory_space<vmem>>) attributes {dimension_semantics = [#tpu.dimension_semantics<parallel>], iteration_bounds = array<i64: 1>, scalar_prefetch = 0 : i64, scratch_operands = 0 : i64, tpu.core_type = #tpu.core_type<tc>, window_params = [{transform_indices = @transform_0, window_bounds = array<i64: 16, 32>}, {pipeline_mode = #tpu.pipeline_mode<synchronous>, transform_indices = @transform_1, window_bounds = array<i64: 32, 128>}, {pipeline_mode = #tpu.pipeline_mode<synchronous>, transform_indices = @transform_2, window_bounds = array<i64: 3, 128>}, {transform_indices = @transform_3, window_bounds = array<i64: 16, 128>}]} {
    %c0 = arith.constant 0 : index
    %c0_0 = arith.constant 0 : index
    %0 = vector.load %arg1[%c0, %c0_0] : memref<16x32xf32, #tpu.memory_space<vmem>>, vector<16x32xf32>
    %1 = arith.truncf %0 : vector<16x32xf32> to vector<16x32xbf16>
    %c0_1 = arith.constant 0 : index
    %c0_2 = arith.constant 0 : index
    %2 = vector.load %arg2[%c0_1, %c0_2] : memref<32x128xbf16, #tpu.memory_space<vmem>>, vector<32x128xbf16>
    %cst = arith.constant dense<0.000000e+00> : vector<16x128xf32>
    %3 = tpu.matmul %1, %2, %cst {dimension_numbers = #tpu.dot_dimension_numbers<[1], [0], [0], [1], [0, 0, 1, 1], [], []>} : vector<16x32xbf16>, vector<32x128xbf16>, vector<16x128xf32> -> vector<16x128xf32>
    %c0_3 = arith.constant 0 : index
    %c0_4 = arith.constant 0 : index
    %4 = vector.load %arg3[%c0_3, %c0_4] : memref<3x128xf32, #tpu.memory_space<vmem>>, vector<1x128xf32>
    %5 = vector.broadcast %4 : vector<1x128xf32> to vector<16x128xf32>
    %6 = arith.addf %3, %5 : vector<16x128xf32>
    %cst_5 = arith.constant dense<0.000000e+00> : vector<16xf32>
    %7 = vector.multi_reduction <add>, %6, %cst_5 [1] : vector<16x128xf32> to vector<16xf32>
    %8 = vector.shape_cast %7 : vector<16xf32> to vector<16x1xf32>
    %9 = arith.mulf %6, %6 : vector<16x128xf32>
    %cst_6 = arith.constant dense<0.000000e+00> : vector<16xf32>
    %10 = vector.multi_reduction <add>, %9, %cst_6 [1] : vector<16x128xf32> to vector<16xf32>
    %11 = vector.shape_cast %10 : vector<16xf32> to vector<16x1xf32>
    %cst_7 = arith.constant 1.562500e-02 : f32
    %12 = vector.broadcast %cst_7 : f32 to vector<16x1xf32>
    %13 = arith.mulf %8, %12 : vector<16x1xf32>
    %cst_8 = arith.constant 1.562500e-02 : f32
    %14 = vector.broadcast %cst_8 : f32 to vector<16x1xf32>
    %15 = arith.mulf %11, %14 : vector<16x1xf32>
    %16 = arith.mulf %13, %13 : vector<16x1xf32>
    %17 = arith.subf %15, %16 : vector<16x1xf32>
    %cst_9 = arith.constant 0.000000e+00 : f32
    %18 = vector.broadcast %cst_9 : f32 to vector<16x1xf32>
    %19 = arith.maximumf %17, %18 : vector<16x1xf32>
    %cst_10 = arith.constant 9.99999974E-6 : f32
    %20 = vector.broadcast %cst_10 : f32 to vector<16x1xf32>
    %21 = arith.addf %19, %20 : vector<16x1xf32>
    %22 = math.rsqrt %21 : vector<16x1xf32>
    %23 = vector.broadcast %13 : vector<16x1xf32> to vector<16x128xf32>
    %24 = arith.subf %6, %23 : vector<16x128xf32>
    %25 = vector.broadcast %22 : vector<16x1xf32> to vector<16x128xf32>
    %26 = arith.mulf %24, %25 : vector<16x128xf32>
    %c1 = arith.constant 1 : index
    %c0_11 = arith.constant 0 : index
    %27 = vector.load %arg3[%c1, %c0_11] : memref<3x128xf32, #tpu.memory_space<vmem>>, vector<1x128xf32>
    %28 = vector.broadcast %27 : vector<1x128xf32> to vector<16x128xf32>
    %29 = arith.mulf %26, %28 : vector<16x128xf32>
    %c2 = arith.constant 2 : index
    %c0_12 = arith.constant 0 : index
    %30 = vector.load %arg3[%c2, %c0_12] : memref<3x128xf32, #tpu.memory_space<vmem>>, vector<1x128xf32>
    %31 = vector.broadcast %30 : vector<1x128xf32> to vector<16x128xf32>
    %32 = arith.addf %29, %31 : vector<16x128xf32>
    %cst_13 = arith.constant 0.000000e+00 : f32
    %33 = vector.broadcast %cst_13 : f32 to vector<16x128xf32>
    %34 = arith.maximumf %32, %33 : vector<16x128xf32>
    %35 = arith.truncf %34 : vector<16x128xf32> to vector<16x128xbf16>
    %c0_14 = arith.constant 0 : index
    %c0_15 = arith.constant 0 : index
    %36 = vector.load %arg4[%c0_14, %c0_15] : memref<16x128xbf16, #tpu.memory_space<vmem>>, vector<16x128xbf16>
    tpu.vector_store %arg4[%c0_14, %c0_15], %35 {strides = array<i32>} : memref<16x128xbf16, #tpu.memory_space<vmem>>, vector<16x128xbf16>,
    return
  }
  func.func @transform_0(%arg0: i32) -> (i32, i32) {
    %c0_i32 = arith.constant 0 : i32
    %c0_i32_0 = arith.constant 0 : i32
    return %arg0, %c0_i32 : i32, i32
  }
  func.func @transform_1(%arg0: i32) -> (i32, i32) {
    %c0_i32 = arith.constant 0 : i32
    %c0_i32_0 = arith.constant 0 : i32
    %c0_i32_1 = arith.constant 0 : i32
    return %c0_i32, %c0_i32_0 : i32, i32
  }
  func.func @transform_2(%arg0: i32) -> (i32, i32) {
    %c0_i32 = arith.constant 0 : i32
    %c0_i32_0 = arith.constant 0 : i32
    %c0_i32_1 = arith.constant 0 : i32
    return %c0_i32, %c0_i32_0 : i32, i32
  }
  func.func @transform_3(%arg0: i32) -> (i32, i32) {
    %c0_i32 = arith.constant 0 : i32
    %c0_i32_0 = arith.constant 0 : i32
    return %arg0, %c0_i32 : i32, i32
  }
}

</mosaic_0001>

<bundles_post_ra>
// kernel: tpu_custom_call.1
= control target key start
LH: loop header
LB: loop body
LE: loop exit
PB: predicated region body
PF: predicated region fallthrough
CT: control target
= control target key end

     0   :  { %8 = vsyncpa [#allocation3], 0  ;;  %s372_s0 = inlined_call_operand.hbm [shape: f32[16,32], index: 0, kind: input, shape index: {}]   ;;  %s373_s1 = inlined_call_operand.hbm [shape: bf16[32,128], index: 1, kind: input, shape index: {}]   ;;  %s374_s2 = inlined_call_operand.hbm [shape: f32[3,128], index: 2, kind: input, shape index: {}]   ;;  %s375_s3 = inlined_call_operand.hbm [shape: bf16[16,128], index: 3, kind: output, shape index: {}]  }
   0x1   :  { %9 = vsyncpa [#allocation6], 0 }
   0x2   :  { %10 = vsyncpa [#allocation4], 0  ;;  %s324_s12 = smov [#allocation5]  }
   0x3   :  { %s28_s13 = sshll.u32 %s324_s12, 4  ;;  %s29_s13 = int_to_ptr.vmem [resolvable:$true] %s28_s13 }
   0x4   :  { %s246_s14 = scalar_lea.vmem %s29_s13, 256  ;;  %p251_p1 = scmp.lt.s32.totalorder %s29_s13, %s29_s13 }
   0x5   :  { %p247_p0 = scmp.ne.s32.totalorder %s29_s13, %s246_s14  ;;  %p252_p2 = scmp.lt.s32.totalorder %s246_s14, %s246_s14 }
   0x7   :  { %p253_p3 = por %p252_p2, %p251_p1 }
   0x9   :  { %p254_p4 = pnand %p253_p3, %p247_p0 }
   0xb   :  { %257 = shalt.err (!%p254_p4)
}
   0xc   :  { %s325_s15 = smov 64   ;;  %s326_s16 = smov 4  }
   0xd   :  { %34 = dma.hbm_to_vmem [thread:$0]  %s373_s1, 256, %s29_s13, [#allocation6], %s325_s15, %s325_s15, %s326_s16  }
   0xe   :  { %s327_s19 = smov [#allocation2]  }
   0xf   :  { %s16_s20 = sshll.u32 %s327_s19, 4  ;;  %s17_s20 = int_to_ptr.vmem [resolvable:$true] %s16_s20 }
  0x10   :  { %s266_s21 = scalar_lea.vmem %s17_s20, 256  ;;  %p271_p6 = scmp.lt.s32.totalorder %s17_s20, %s17_s20 }
  0x11   :  { %p267_p5 = scmp.ne.s32.totalorder %s17_s20, %s266_s21  ;;  %p272_p7 = scmp.lt.s32.totalorder %s266_s21, %s266_s21 }
  0x13   :  { %p273_p8 = por %p272_p7, %p271_p6 }
  0x15   :  { %p274_p9 = pnand %p273_p8, %p267_p5 }
  0x17   :  { %277 = shalt.err (!%p274_p9)
}
  0x18   :  { %s328_s22 = smov 128   ;;  %s329_s23 = smov 8  }
  0x19   :  { %22 = dma.hbm_to_vmem [thread:$0]  %s372_s0, 256, %s17_s20, [#allocation3], %s328_s22, %s328_s22, %s329_s23  }
  0x1a   :  { %s330_s26 = smov [#allocation7]  }
  0x1b   :  { %s41_s27 = sshll.u32 %s330_s26, 4  ;;  %s42_s27 = int_to_ptr.vmem [resolvable:$true] %s41_s27 }
  0x1c   :  { %s286_s1 = scalar_lea.vmem %s42_s27, 64  ;;  %p291_p11 = scmp.lt.s32.totalorder %s42_s27, %s42_s27 }
  0x1d   :  { %p287_p10 = scmp.ne.s32.totalorder %s42_s27, %s286_s1  ;;  %p292_p12 = scmp.lt.s32.totalorder %s286_s1, %s286_s1 }
  0x1f   :  { %p293_p13 = por %p292_p12, %p291_p11 }
  0x21   :  { %p294_p0 = pnand %p293_p13, %p287_p10 }
  0x23   :  { %297 = shalt.err (!%p294_p0)
}
  0x24   :  { %44 = dma.hbm_to_vmem [thread:$0]  %s374_s2, 64, %s42_s27, [#allocation6]  }
  0x25   :  { %318 = dma.done.wait [#allocation3], 256  }
  0x26   :  { %319 = vsyncadd [#allocation3], 4294967040 }
  0x27   :  { %320 = dma.done.wait [#allocation6], 320  }
  0x28   :  { %321 = vsyncadd [#allocation6], 4294966976  ;;  %v331_v0 = vmov 0.0   ;;  %vm332_vm0 = vmmov 0   ;;  %v232_v1 = vld [vmem:[#allocation5 + $0x8] sm:$0xff]   ;;  %v233_v2 = vld [vmem:[#allocation5] sm:$0xff]  }
  0x29   :  { %214 = vmatprep.subr.bf16.mxu0 %v331_v0  ;;  %218 = vmatprep.mubr.msk.bf16.mxu0 %vm332_vm0, %v331_v0  ;;  %v55_v3 = vld [vmem:[#allocation2] sm:$0xff]  ;;  %v56_v4 = vld [vmem:[#allocation2 + $0x8] sm:$0xff]  ;;  %vm79_vm1 = vcmask 261120   ;;  %s333_s0 = smov [#allocation8]  }
  0x2a   :  { %215 = vmatpush3.bf16.msra.mxu0 %v232_v1  ;;  %v57_v5 = vpack.c.bf16 %v56_v4, %v55_v3  ;;  %v196_v6 = vld [vmem:[#allocation7] ss:$0 sm:$0xff]  ;;  %v200_v33 = vld [vmem:[#allocation7 + $0x1] ss:$0 sm:$0xff]  ;;  %v201_v38 = vld [vmem:[#allocation7 + $0x2] ss:$0 sm:$0xff] }
  0x2b   :  { %216 = vmatprep.subr.bf16.mxu0 %v331_v0  ;;  %s183_s2 = sshll.u32 %s333_s0, 4  ;;  %s184_s2 = int_to_ptr.vmem [resolvable:$true] %s183_s2 }
  0x2c   :  { %s298_s30 = scalar_lea.vmem %s184_s2, 128  ;;  %p303_p2 = scmp.lt.s32.totalorder %s184_s2, %s184_s2 }
  0x2d   :  { %p299_p1 = scmp.ne.s32.totalorder %s184_s2, %s298_s30  ;;  %p304_p3 = scmp.lt.s32.totalorder %s298_s30, %s298_s30 }
  0x2e   :  { %217 = vmatpush3.bf16.msra.mxu0 %v233_v2 }
  0x2f   :  { %p305_p4 = por %p304_p3, %p303_p2 }
  0x31   :  { %219 = vmatmul.mubr.msk.bf16.vlgmr.msra.gmra.mxu0 %vm79_vm1, %v57_v5  ;;  %p306_p5 = pnand %p305_p4, %p299_p1 }
  0xf1   :  { %v117_v7 = vpop.f32.mrf.mxu0 }
  0xf2   :  { %v118_v8 = vadd.f32 %v196_v6, %v117_v7 }
  0xf3   :  { %v220_v9 = vpop.f32.mrf.mxu0 }
  0xf4   :  { %124 = vadd.xlane.f32.xlu0 %v118_v8  ;;  %v128_v10 = vmul.f32 %v118_v8, %v118_v8 }
  0xf5   :  { %v120_v11 = vpop.f32.mrf.mxu0 }
  0xf6   :  { %v121_v12 = vadd.f32 %v196_v6, %v120_v11  ;;  %130 = vadd.xlane.f32.xlu1 %v128_v10 }
  0xf7   :  { %v221_v13 = vpop.f32.mrf.mxu0 }
  0xf8   :  { %126 = vadd.xlane.f32.xlu0 %v121_v12  ;;  %v129_v14 = vmul.f32 %v121_v12, %v121_v12 }
  0xfa   :  { %132 = vadd.xlane.f32.xlu1 %v129_v14 }
 0x17d   :  { %v125_v15 = vpop.xlane.xlu0 %124 }
 0x17e   :  { %v134_v16 = vmul.f32 0.015625, %v125_v15 }
 0x17f   :  { %v131_v17 = vpop.xlane.xlu1 %130 }
 0x180   :  { %v138_v18 = vmul.f32 %v134_v16, %v134_v16  ;;  %v136_v19 = vmul.f32 0.015625, %v131_v17  ;;  %v148_v31 = vsub.f32 %v118_v8, %v134_v16 }
 0x181   :  { %v127_v20 = vpop.xlane.xlu0 %126 }
 0x182   :  { %v140_v21 = vsub.f32 %v136_v19, %v138_v18  ;;  %v135_v22 = vmul.f32 0.015625, %v127_v20 }
 0x183   :  { %v133_v23 = vpop.xlane.xlu1 %132 }
 0x184   :  { %v142_v24 = vmax.f32 %v140_v21, 0.0  ;;  %v139_v25 = vmul.f32 %v135_v22, %v135_v22  ;;  %v137_v26 = vmul.f32 0.015625, %v133_v23  ;;  %v149_v35 = vsub.f32 %v121_v12, %v135_v22 }
 0x186   :  { %v144_v27 = vadd.f32 1e-05, %v142_v24  ;;  %v141_v28 = vsub.f32 %v137_v26, %v139_v25 }
 0x188   :  { %234 = vrsqrt.f32 %v144_v27  ;;  %v143_v29 = vmax.f32 %v141_v28, 0.0 }
 0x18a   :  { %v145_v30 = vadd.f32 1e-05, %v143_v29 }
 0x18c   :  { %236 = vrsqrt.f32 %v145_v30 }
 0x195   :  { %v235_v32 = vpop.eup %234 }
 0x196   :  { %v150_v34 = vmul.f32 %v235_v32, %v148_v31 }
 0x198   :  { %v157_v36 = vmul.f32 %v200_v33, %v150_v34 }
 0x199   :  { %v237_v37 = vpop.eup %236 }
 0x19a   :  { %v151_v39 = vmul.f32 %v237_v37, %v149_v35  ;;  %v164_v41 = vadd.f32 %v201_v38, %v157_v36 }
 0x19c   :  { %v158_v40 = vmul.f32 %v200_v33, %v151_v39  ;;  %v166_v43 = vmax.f32 %v164_v41, 0.0 }
 0x19e   :  { %v165_v42 = vadd.f32 %v201_v38, %v158_v40 }
 0x1a0   :  { %v167_v44 = vmax.f32 %v165_v42, 0.0 }
 0x1a2   :  { %v209_v45 = vpack.c.bf16 %v167_v44, %v166_v43 }
 0x1a4   :  { %210 = vst [vmem:[#allocation8] sm:$0xff] %v209_v45  }
 0x1a5   :  { %309 = shalt.err (!%p306_p5)
}
 0x1a6   :  { %189 = dma.vmem_to_hbm [thread:$0]  %s184_s2, 128, %s375_s3, [#allocation4], %s325_s15, %s325_s15, %s326_s16  }
 0x1a7   :  { %322 = dma.done.wait [#allocation4], 128  }
 0x1a8   :  { %323 = vsyncadd [#allocation4], 4294967168 }
 0x1a9   :  { %193 = vsyncpa [#allocation3], 1 }
 0x1aa   :  { %194 = vsyncpa [#allocation6], 1 }
 0x1ab   :  { %195 = vsyncpa [#allocation4], 1 }

</bundles_post_ra>
